<compile_context>
chip_gen: v6e
topology: v6e:2x2x1
jax: 0.10.0
libtpu: 0.0.40
codegen_flags: <defaults>
</compile_context>

<pallas_src>
import jax
import jax.numpy as jnp
from jax.experimental import pallas as pl
from jax.experimental.pallas import tpu as pltpu

LANES = 128


def mlp_kernel(x_ref, wb_ref, b2_ref, o_ref):
    # x_ref : (1, P)  VMEM -- batch on the lane axis, zero-padded to P lanes
    # wb_ref: (H, 3)  VMEM -- packed parameter columns [w1 | b1 | w2]
    # b2_ref: (1, 1)  SMEM -- output-layer bias scalar
    # o_ref : (1, P)  VMEM -- lane-dense output, batch on lanes
    w1 = wb_ref[:, 0:1]  # (H, 1) static lane slices: near-free Ref views
    b1 = wb_ref[:, 1:2]
    w2 = wb_ref[:, 2:3]

    # hidden = relu(x @ W1 + b1): VPU broadcast outer product (H,1)*(1,P)->(H,P).
    h = jnp.maximum(w1 * x_ref[...] + b1, 0.0)

    # predict = hidden @ W2 + b2: VPU multiply + XLU sublane reduce -> (1,P),
    # plus an SMEM scalar add for b2.
    y = jnp.sum(h * w2, axis=0, keepdims=True) + b2_ref[0, 0]

    o_ref[...] = y.astype(o_ref.dtype)


def pack_params(w1, b1, w2, b2):
    """One-time layout plumbing: pack [w1 | b1 | w2] into a single (H, 3) slab.

    Weight layout convention: w1 is [in_features, out_features] = (1, H),
    w2 is (H, 1), so forward is relu(x @ w1 + b1) @ w2 + b2.
    """
    n_feature, n_hidden = w1.shape
    n_output = w2.shape[1]
    assert n_feature == 1 and n_output == 1, "kernel specialized to 1-in / 1-out Net"
    wb = jnp.stack(
        [w1.reshape(n_hidden), b1.reshape(n_hidden), w2.reshape(n_hidden)], axis=1
    )  # (H, 3)
    b2_s = b2.reshape(1, 1)
    return wb, b2_s


def _pallas_forward(x_lane, wb, b2_s):
    padded = x_lane.shape[1]
    vmem = pl.BlockSpec(memory_space=pltpu.MemorySpace.VMEM)
    smem = pl.BlockSpec(memory_space=pltpu.MemorySpace.SMEM)
    return pl.pallas_call(
        mlp_kernel,
        out_shape=jax.ShapeDtypeStruct((1, padded), x_lane.dtype),
        in_specs=[vmem, vmem, smem],
        out_specs=vmem,
    )(x_lane, wb, b2_s)


@jax.jit
def net_forward(x, wb, b2_s):
    """Forward pass of Net: relu(x @ W1 + b1) @ W2 + b2, for (batch, 1) inputs."""
    batch = x.shape[0]
    padded = pl.cdiv(batch, LANES) * LANES
    # Single pad to put the batch on the lane axis (fused by XLA around the call).
    x_lane = jnp.pad(x[:, 0], (0, padded - batch)).reshape(1, padded)
    y_lane = _pallas_forward(x_lane, wb, b2_s)
    # Strip the garbage padded lanes and restore the (batch, n_output) layout.
    return y_lane[0, :batch].reshape(batch, 1)


def init_linear_params(key, in_features, out_features, dtype=jnp.float32):
    """Deterministic init matching torch.nn.Linear's U(-1/sqrt(fan_in), +1/sqrt(fan_in))."""
    kw, kb = jax.random.split(key)
    bound = 1.0 / (in_features ** 0.5)
    # stored as [in_features, out_features] so forward uses x @ W
    w = jax.random.uniform(kw, (in_features, out_features), dtype, -bound, bound)
    b = jax.random.uniform(kb, (out_features,), dtype, -bound, bound)
    return w, b


if __name__ == "__main__":
    # Mirrors the reference script: x = unsqueeze(linspace(-1, 1, 100), dim=1)
    n_feature, n_hidden, n_output = 1, 32, 1
    batch = 100

    key = jax.random.PRNGKey(0)
    k1, k2 = jax.random.split(key)
    w1, b1 = init_linear_params(k1, n_feature, n_hidden)
    w2, b2 = init_linear_params(k2, n_hidden, n_output)

    # One-time parameter packing (outside the hot path).
    wb, b2_s = pack_params(w1, b1, w2, b2)

    x = jnp.linspace(-1.0, 1.0, batch, dtype=jnp.float32).reshape(batch, 1)

    y = net_forward(x, wb, b2_s)
    jax.block_until_ready(y)

    # Reference check in plain JAX
    y_ref = jnp.maximum(x @ w1 + b1, 0.0) @ w2 + b2
    assert y.shape == (batch, n_output)
    assert jnp.allclose(y, y_ref, atol=1e-5, rtol=1e-5)

    print("KERNEL_OK")
</pallas_src>

<mosaic_0001>
module attributes {stable_mosaic.version = 11 : i64} {
  func.func @mlp_kernel(%arg0: memref<1x128xf32, #tpu.memory_space<vmem>>, %arg1: memref<32x3xf32, #tpu.memory_space<vmem>>, %arg2: memref<1x1xf32, #tpu.memory_space<smem>>, %arg3: memref<1x128xf32, #tpu.memory_space<vmem>>) attributes {dimension_semantics = [], scalar_prefetch = 0 : i64, scratch_operands = 0 : i64, tpu.core_type = #tpu.core_type<tc>} {
    %c0 = arith.constant 0 : index
    %c0_0 = arith.constant 0 : index
    %0 = vector.load %arg1[%c0, %c0_0] : memref<32x3xf32, #tpu.memory_space<vmem>>, vector<32x1xf32>
    %c0_1 = arith.constant 0 : index
    %c1 = arith.constant 1 : index
    %1 = vector.load %arg1[%c0_1, %c1] : memref<32x3xf32, #tpu.memory_space<vmem>>, vector<32x1xf32>
    %c0_2 = arith.constant 0 : index
    %c2 = arith.constant 2 : index
    %2 = vector.load %arg1[%c0_2, %c2] : memref<32x3xf32, #tpu.memory_space<vmem>>, vector<32x1xf32>
    %c0_3 = arith.constant 0 : index
    %c0_4 = arith.constant 0 : index
    %3 = vector.load %arg0[%c0_3, %c0_4] : memref<1x128xf32, #tpu.memory_space<vmem>>, vector<1x128xf32>
    %4 = vector.broadcast %0 : vector<32x1xf32> to vector<32x128xf32>
    %5 = vector.broadcast %3 : vector<1x128xf32> to vector<32x128xf32>
    %6 = arith.mulf %4, %5 : vector<32x128xf32>
    %7 = vector.broadcast %1 : vector<32x1xf32> to vector<32x128xf32>
    %8 = arith.addf %6, %7 : vector<32x128xf32>
    %cst = arith.constant 0.000000e+00 : f32
    %9 = vector.broadcast %cst : f32 to vector<32x128xf32>
    %10 = arith.maximumf %8, %9 : vector<32x128xf32>
    %11 = vector.broadcast %2 : vector<32x1xf32> to vector<32x128xf32>
    %12 = arith.mulf %10, %11 : vector<32x128xf32>
    %cst_5 = arith.constant dense<0.000000e+00> : vector<128xf32>
    %13 = vector.multi_reduction <add>, %12, %cst_5 [0] : vector<32x128xf32> to vector<128xf32>
    %14 = vector.shape_cast %13 : vector<128xf32> to vector<1x128xf32>
    %c0_6 = arith.constant 0 : index
    %c0_7 = arith.constant 0 : index
    %15 = memref.load %arg2[%c0_6, %c0_7] : memref<1x1xf32, #tpu.memory_space<smem>>
    %16 = vector.broadcast %15 : f32 to vector<1x128xf32>
    %17 = arith.addf %14, %16 : vector<1x128xf32>
    %c0_8 = arith.constant 0 : index
    %c0_9 = arith.constant 0 : index
    %18 = vector.load %arg3[%c0_8, %c0_9] : memref<1x128xf32, #tpu.memory_space<vmem>>, vector<1x128xf32>
    tpu.vector_store %arg3[%c0_8, %c0_9], %17 {strides = array<i32>} : memref<1x128xf32, #tpu.memory_space<vmem>>, vector<1x128xf32>,
    return
  }
}

</mosaic_0001>

<bundles_post_ra>
// kernel: net_forward.1
= control target key start
LH: loop header
LB: loop body
LE: loop exit
PB: predicated region body
PF: predicated region fallthrough
CT: control target
= control target key end

     0   :  { %v123_v0 = vmov 0   ;;  %v124_v4 = vmov 1   ;;  %v125_v6 = vmov 2   ;;  %s167_s1 = inlined_call_operand.vmem [shape: f32[32,3], index: 1, kind: input, shape index: {}]   ;;  %s168_s0 = inlined_call_operand.vmem [shape: f32[1,128], index: 0, kind: input, shape index: {}]   ;;  %s169_s2 = inlined_call_operand.<no memory space> [shape: f32[1,1], index: 2, kind: input, shape index: {}]   ;;  %s170_s3 = inlined_call_operand.vmem [shape: f32[1,128], index: 3, kind: output, shape index: {}]  }
   0x1   :  { %116 = vset.pattern.permute.xlu1 %v123_v0  ;;  %115 = vset.pattern.permute.xlu0 %v123_v0  ;;  %v17_v1 = vld [vmem:[%s167_s1 + $0x10] sm:$0xff]  ;;  %v15_v2 = vld [vmem:[%s167_s1] sm:$0xff]  ;;  %v16_v3 = vld [vmem:[%s167_s1 + $0x8] sm:$0xff]  ;;  %v104_v44 = vstv %s169_s2 }
   0x2   :  { %32 = vperm.xlu1 %116, %v17_v1   ;;  %22 = vperm.xlu0 %115, %v15_v2   ;;  %v18_v5 = vld [vmem:[%s167_s1 + $0x18] sm:$0xff]  ;;  %v111_v13 = vld [vmem:[%s168_s0] ss:$0 sm:$0xff] }
   0x6   :  { %117 = vset.pattern.permute.xlu1 %v124_v4  ;;  %27 = vperm.xlu0 %115, %v16_v3  }
   0x7   :  { %51 = vperm.xlu1 %117, %v15_v2  }
   0xa   :  { %118 = vset.pattern.permute.xlu0 %v124_v4 }
   0xb   :  { %119 = vset.pattern.permute.xlu1 %v123_v0  ;;  %55 = vperm.xlu0 %118, %v16_v3  }
   0xc   :  { %37 = vperm.xlu1 %119, %v18_v5  }
   0xf   :  { %63 = vperm.xlu0 %118, %v18_v5  }
  0x10   :  { %120 = vset.pattern.permute.xlu1 %v124_v4 }
  0x11   :  { %59 = vperm.xlu1 %120, %v17_v1  }
  0x13   :  { %122 = vset.pattern.permute.xlu0 %v125_v6 }
  0x14   :  { %79 = vperm.xlu0 %122, %v16_v3  }
  0x15   :  { %121 = vset.pattern.permute.xlu1 %v125_v6 }
  0x16   :  { %75 = vperm.xlu1 %121, %v15_v2  }
  0x1a   :  { %83 = vperm.xlu1 %121, %v17_v1  }
  0x1e   :  { %87 = vperm.xlu1 %121, %v18_v5  }
  0x7d   :  { %v33_v7 = vpop.permute.xlu1 %32  ;;  %v23_v8 = vpop.permute.xlu0 %22 }
  0x7e   :  { %v46_v14 = vmul.f32 %v111_v13, %v23_v8  ;;  %v48_v18 = vmul.f32 %v111_v13, %v33_v7 }
  0x81   :  { %v28_v9 = vpop.permute.xlu0 %27 }
  0x82   :  { %v52_v10 = vpop.permute.xlu1 %51  ;;  %v47_v15 = vmul.f32 %v111_v13, %v28_v9 }
  0x83   :  { %v66_v19 = vadd.f32 %v52_v10, %v46_v14 }
  0x85   :  { %v70_v24 = vmax.f32 %v66_v19, 0.0 }
  0x86   :  { %v56_v11 = vpop.permute.xlu0 %55 }
  0x87   :  { %v38_v12 = vpop.permute.xlu1 %37  ;;  %v67_v20 = vadd.f32 %v56_v11, %v47_v15 }
  0x88   :  { %v49_v21 = vmul.f32 %v111_v13, %v38_v12 }
  0x89   :  { %v71_v26 = vmax.f32 %v67_v20, 0.0 }
  0x8a   :  { %v64_v17 = vpop.permute.xlu0 %63 }
  0x8b   :  { %v69_v27 = vadd.f32 %v64_v17, %v49_v21 }
  0x8c   :  { %v60_v16 = vpop.permute.xlu1 %59 }
  0x8d   :  { %v68_v22 = vadd.f32 %v60_v16, %v48_v18  ;;  %v73_v33 = vmax.f32 %v69_v27, 0.0 }
  0x8f   :  { %v80_v25 = vpop.permute.xlu0 %79  ;;  %v72_v28 = vmax.f32 %v68_v22, 0.0 }
  0x90   :  { %v91_v31 = vmul.f32 %v80_v25, %v71_v26 }
  0x91   :  { %v76_v23 = vpop.permute.xlu1 %75 }
  0x92   :  { %v90_v29 = vmul.f32 %v76_v23, %v70_v24 }
  0x94   :  { %v94_v34 = vadd.f32 %v91_v31, %v90_v29 }
  0x95   :  { %v84_v30 = vpop.permute.xlu1 %83 }
  0x96   :  { %v92_v32 = vmul.f32 %v84_v30, %v72_v28 }
  0x98   :  { %v95_v36 = vadd.f32 %v94_v34, %v92_v32 }
  0x99   :  { %v88_v35 = vpop.permute.xlu1 %87 }
  0x9a   :  { %v93_v37 = vmul.f32 %v88_v35, %v73_v33 }
  0x9c   :  { %v96_v38 = vadd.f32 %v95_v36, %v93_v37 }
  0x9e   :  { %v97_v39 = vrot.slane %v96_v38, 4 }
  0xa0   :  { %v98_v40 = vadd.f32 %v97_v39, %v96_v38 }
  0xa2   :  { %v99_v41 = vrot.slane %v98_v40, 2 }
  0xa4   :  { %v100_v42 = vadd.f32 %v99_v41, %v98_v40 }
  0xa6   :  { %v101_v43 = vrot.slane %v100_v42, 1 }
  0xa8   :  { %v102_v45 = vadd.f32 %v101_v43, %v100_v42 }
  0xaa   :  { %v105_v46 = vadd.f32 %v104_v44, %v102_v45 }
  0xac   :  { %106 = vst [vmem:[%s170_s3] sm:$0x1] %v105_v46 }

</bundles_post_ra>
